<compile_context>
chip_gen: v6e
topology: v6e:2x2x1
jax: 0.10.0
libtpu: 0.0.40
codegen_flags: <defaults>
</compile_context>

<pallas_src>
import jax
import jax.numpy as jnp
from jax.experimental import pallas as pl
from jax.experimental.pallas import tpu as pltpu


def _round_up(x, m):
    return (x + m - 1) // m * m


def patch_embed_kernel(rows_ref, w_ref, posb_ref, out_ref):
    # rows_ref: (TILE_M, K)       bf16  flattened patch rows (im2col)
    # w_ref:    (K, E_TILE)       bf16  projection weight tile (VMEM-resident)
    # posb_ref: (TILE_M, E_TILE)  f32   positions[1:] + conv bias, repeats per image
    # out_ref:  (TILE_M, E_TILE)        output dtype
    proj = jnp.dot(rows_ref[...], w_ref[...],
                   preferred_element_type=jnp.float32)          # MXU, f32 acc
    out_ref[...] = (proj + posb_ref[...]).astype(out_ref.dtype)


def patch_embedding(x, conv_w, conv_b, cls_token, positions, patch_size):
    """x: [B, C, H, W].  Returns [B, N+1, E] (== PyTorch PatchEmbedding.forward)."""
    B, C, H, W = x.shape
    p = patch_size
    hp, wp = H // p, W // p
    N = hp * wp
    E = conv_w.shape[0]
    K = C * p * p
    out_dtype = x.dtype
    out_bytes = jnp.dtype(out_dtype).itemsize

    # --- im2col for the stride==kernel Conv2d (pure layout, bf16) -----------
    # Cast to bf16 before the transpose so the one materialized wrapper pass
    # moves half the bytes.
    # TODO(synk): fuse the im2col into the kernel (block x as (1, C, p, W)
    # strips and rearrange in VMEM) to drop this materialized pass entirely.
    x16 = x.astype(jnp.bfloat16)
    patches = x16.reshape(B, C, hp, p, wp, p).transpose(0, 2, 4, 1, 3, 5)
    rows = patches.reshape(B * N, K)              # leading-dim collapse: free

    # --- tiling choices ------------------------------------------------------
    E_pad = _round_up(E, 128)                     # lane-dense output
    if K * E_pad * 2 <= (8 << 20):                # weight fully VMEM-resident
        E_TILE = E_pad
    else:                                         # rare: tile E, e axis outermost
        E_TILE = 256 if E_pad % 256 == 0 else 128

    # M tiles = whole images (k images per tile) so the pos+bias rows repeat
    # tile-to-tile and can be a single constant-index-map operand.
    base = 1
    while (base * N) % 8:                         # 8-sublane alignment
        base *= 2                                 # base in {1, 2, 4, 8}

    def vmem_est(tile_m):
        return (2 * tile_m * K * 2                # rows, bf16, double-buffered
                + 2 * tile_m * E_TILE * 4         # pos+bias, f32
                + 2 * tile_m * E_TILE * out_bytes # output
                + 2 * K * E_TILE * 2)             # weight, bf16

    TARGET_ROWS = 512                             # ~85% of HBM roofline per sweeps
    VMEM_BUDGET = 12 << 20                        # inside v5e's 16 MiB scoped default
    k = base
    while (2 * k * N <= TARGET_ROWS
           and _round_up(B, 2 * k) == _round_up(B, base)   # don't grow batch padding
           and vmem_est(2 * k * N) <= VMEM_BUDGET):
        k *= 2
    TILE_M = k * N
    B_pad = _round_up(B, k)
    M = B * N
    M_pad = B_pad * N
    if M_pad != M:                                # rare: pad batch to the tile
        rows = jnp.pad(rows, ((0, M_pad - M), (0, 0)))

    def pad_last(a, width):
        return jnp.pad(a, [(0, 0)] * (a.ndim - 1) + [(0, width - a.shape[-1])])

    w_mat = pad_last(conv_w.reshape(E, K).T, E_pad).astype(jnp.bfloat16)   # [K, E_pad]
    # Per-row epilogue operand: positions[1:] + conv bias, folded once here.
    posb = (positions[1:].astype(jnp.float32)
            + conv_b.astype(jnp.float32)[None, :])                          # [N, E]
    posb = jnp.tile(pad_last(posb, E_pad), (k, 1))                          # [TILE_M, E_pad]

    grid = (E_pad // E_TILE, M_pad // TILE_M)     # e OUTER, m inner
    out_flat = pl.pallas_call(
        patch_embed_kernel,
        out_shape=jax.ShapeDtypeStruct((M_pad, E_pad), out_dtype),
        grid_spec=pltpu.PrefetchScalarGridSpec(
            num_scalar_prefetch=0,
            grid=grid,
            in_specs=[
                pl.BlockSpec((TILE_M, K), lambda e, m: (m, 0)),
                pl.BlockSpec((K, E_TILE), lambda e, m: (0, e)),       # resident
                pl.BlockSpec((TILE_M, E_TILE), lambda e, m: (0, e)),  # resident
            ],
            out_specs=pl.BlockSpec((TILE_M, E_TILE), lambda e, m: (m, e)),
        ),
        compiler_params=pltpu.CompilerParams(
            dimension_semantics=("parallel", "parallel")),
    )(rows, w_mat, posb)

    proj = out_flat[:M, :E].reshape(B, N, E)
    # cls row: exact f32 cls_token + positions[0] on only B*E elements.
    cls_row = (cls_token.reshape(1, 1, E).astype(jnp.float32)
               + positions[0].reshape(1, 1, E).astype(jnp.float32))
    cls_rows = jnp.broadcast_to(cls_row, (B, 1, E)).astype(out_dtype)
    return jnp.concatenate([cls_rows, proj], axis=1)


def reference(x, conv_w, conv_b, cls_token, positions, patch_size):
    """Pure-JAX f32 reference matching the PyTorch module."""
    B, C, H, W = x.shape
    p = patch_size
    hp, wp = H // p, W // p
    N = hp * wp
    E = conv_w.shape[0]
    patches = x.reshape(B, C, hp, p, wp, p).transpose(0, 2, 4, 1, 3, 5)
    patches = patches.reshape(B, N, C * p * p)
    proj = jnp.einsum('bnk,ek->bne', patches, conv_w.reshape(E, -1)) + conv_b
    cls = jnp.broadcast_to(cls_token, (B, 1, E))
    return jnp.concatenate([cls, proj], axis=1) + positions


if __name__ == "__main__":
    # Small shapes consistent with the module: in_channel=3, patch=4, emb=32, img=16
    B, C, H, W = 2, 3, 16, 16
    p = 4
    E = 32
    N = (H // p) * (W // p)            # 16 patches -> seq len 17

    key = jax.random.PRNGKey(0)
    kx, kw, kb, kc, kp = jax.random.split(key, 5)
    x = jax.random.normal(kx, (B, C, H, W), dtype=jnp.float32)
    conv_w = jax.random.normal(kw, (E, C, p, p), dtype=jnp.float32) * 0.02
    conv_b = jax.random.normal(kb, (E,), dtype=jnp.float32) * 0.02
    cls_token = jax.random.normal(kc, (1, 1, E), dtype=jnp.float32)
    positions = jax.random.normal(kp, (N + 1, E), dtype=jnp.float32)

    out = patch_embedding(x, conv_w, conv_b, cls_token, positions, p)
    out = jax.block_until_ready(out)

    ref = reference(x, conv_w, conv_b, cls_token, positions, p)
    assert out.shape == (B, N + 1, E), out.shape
    # bf16 MXU operands with f32 accumulation -> small numeric delta vs f32 ref.
    assert jnp.allclose(out, ref, atol=1e-2, rtol=1e-2), \
        float(jnp.max(jnp.abs(out - ref)))
    print("KERNEL_OK")
</pallas_src>

<mosaic_0001>
module attributes {stable_mosaic.version = 11 : i64} {
  func.func @patch_embed_kernel(%arg0: i32, %arg1: i32, %arg2: memref<32x48xbf16, #tpu.memory_space<vmem>>, %arg3: memref<48x128xbf16, #tpu.memory_space<vmem>>, %arg4: memref<32x128xf32, #tpu.memory_space<vmem>>, %arg5: memref<32x128xf32, #tpu.memory_space<vmem>>) attributes {dimension_semantics = [#tpu.dimension_semantics<parallel>, #tpu.dimension_semantics<parallel>], iteration_bounds = array<i64: 1, 1>, scalar_prefetch = 0 : i64, scratch_operands = 0 : i64, tpu.core_type = #tpu.core_type<tc>, window_params = [{transform_indices = @transform_0, window_bounds = array<i64: 32, 48>}, {transform_indices = @transform_1, window_bounds = array<i64: 48, 128>}, {transform_indices = @transform_2, window_bounds = array<i64: 32, 128>}, {transform_indices = @transform_3, window_bounds = array<i64: 32, 128>}]} {
    %c0 = arith.constant 0 : index
    %c0_0 = arith.constant 0 : index
    %0 = vector.load %arg2[%c0, %c0_0] : memref<32x48xbf16, #tpu.memory_space<vmem>>, vector<32x48xbf16>
    %c0_1 = arith.constant 0 : index
    %c0_2 = arith.constant 0 : index
    %1 = vector.load %arg3[%c0_1, %c0_2] : memref<48x128xbf16, #tpu.memory_space<vmem>>, vector<48x128xbf16>
    %cst = arith.constant dense<0.000000e+00> : vector<32x128xf32>
    %2 = tpu.matmul %0, %1, %cst {dimension_numbers = #tpu.dot_dimension_numbers<[1], [0], [0], [1], [0, 0, 1, 1], [], []>} : vector<32x48xbf16>, vector<48x128xbf16>, vector<32x128xf32> -> vector<32x128xf32>
    %c0_3 = arith.constant 0 : index
    %c0_4 = arith.constant 0 : index
    %3 = vector.load %arg4[%c0_3, %c0_4] : memref<32x128xf32, #tpu.memory_space<vmem>>, vector<32x128xf32>
    %4 = arith.addf %2, %3 : vector<32x128xf32>
    %c0_5 = arith.constant 0 : index
    %c0_6 = arith.constant 0 : index
    %5 = vector.load %arg5[%c0_5, %c0_6] : memref<32x128xf32, #tpu.memory_space<vmem>>, vector<32x128xf32>
    tpu.vector_store %arg5[%c0_5, %c0_6], %4 {strides = array<i32>} : memref<32x128xf32, #tpu.memory_space<vmem>>, vector<32x128xf32>,
    return
  }
  func.func @transform_0(%arg0: i32, %arg1: i32) -> (i32, i32) {
    %c0_i32 = arith.constant 0 : i32
    %c0_i32_0 = arith.constant 0 : i32
    return %arg1, %c0_i32 : i32, i32
  }
  func.func @transform_1(%arg0: i32, %arg1: i32) -> (i32, i32) {
    %c0_i32 = arith.constant 0 : i32
    %c0_i32_0 = arith.constant 0 : i32
    return %c0_i32, %arg0 : i32, i32
  }
  func.func @transform_2(%arg0: i32, %arg1: i32) -> (i32, i32) {
    %c0_i32 = arith.constant 0 : i32
    %c0_i32_0 = arith.constant 0 : i32
    return %c0_i32, %arg0 : i32, i32
  }
  func.func @transform_3(%arg0: i32, %arg1: i32) -> (i32, i32) {
    %c0_i32 = arith.constant 0 : i32
    return %arg1, %arg0 : i32, i32
  }
}

</mosaic_0001>

<bundles_post_ra>
// kernel: tpu_custom_call.1
= control target key start
LH: loop header
LB: loop body
LE: loop exit
PB: predicated region body
PF: predicated region fallthrough
CT: control target
= control target key end

     0   :  { %8 = vsyncpa [#allocation3], 0  ;;  %s344_s0 = inlined_call_operand.hbm [shape: bf16[32,48], index: 0, kind: input, shape index: {}]   ;;  %s345_s1 = inlined_call_operand.hbm [shape: bf16[48,128], index: 1, kind: input, shape index: {}]   ;;  %s346_s2 = inlined_call_operand.hbm [shape: f32[32,128], index: 2, kind: input, shape index: {}]   ;;  %s347_s3 = inlined_call_operand.hbm [shape: f32[32,128], index: 3, kind: output, shape index: {}]  }
   0x1   :  { %9 = vsyncpa [#allocation6], 0 }
   0x2   :  { %10 = vsyncpa [#allocation4], 0  ;;  %s298_s12 = smov [#allocation5]   ;;  %s299_s14 = smov [#allocation2]  }
   0x3   :  { %s28_s13 = sshll.u32 %s298_s12, 4  ;;  %s16_s15 = sshll.u32 %s299_s14, 4  ;;  %s29_s13 = int_to_ptr.vmem [resolvable:$true] %s28_s13  ;;  %s17_s15 = int_to_ptr.vmem [resolvable:$true] %s16_s15 }
   0x4   :  { %s220_s16 = scalar_lea.vmem %s29_s13, 384  ;;  %p225_p1 = scmp.lt.s32.totalorder %s29_s13, %s29_s13 }
   0x5   :  { %p221_p0 = scmp.ne.s32.totalorder %s29_s13, %s220_s16  ;;  %p226_p2 = scmp.lt.s32.totalorder %s220_s16, %s220_s16 }
   0x7   :  { %p227_p3 = por %p226_p2, %p225_p1 }
   0x9   :  { %p228_p4 = pnand %p227_p3, %p221_p0 }
   0xb   :  { %231 = shalt.err (!%p228_p4)
}
   0xc   :  { %s300_s17 = smov 64   ;;  %s301_s18 = smov 4  }
   0xd   :  { %34 = dma.hbm_to_vmem [thread:$0]  %s345_s1, 384, %s29_s13, [#allocation6], %s300_s17, %s300_s17, %s301_s18  }
   0xe   :  { %s240_s21 = scalar_lea.vmem %s17_s15, 256  ;;  %p245_p6 = scmp.lt.s32.totalorder %s17_s15, %s17_s15 }
   0xf   :  { %p241_p5 = scmp.ne.s32.totalorder %s17_s15, %s240_s21  ;;  %p246_p7 = scmp.lt.s32.totalorder %s240_s21, %s240_s21 }
  0x11   :  { %p247_p8 = por %p246_p7, %p245_p6 }
  0x13   :  { %p248_p9 = pnand %p247_p8, %p241_p5 }
  0x15   :  { %251 = shalt.err (!%p248_p9)
}
  0x16   :  { %22 = dma.hbm_to_vmem [thread:$0]  %s344_s0, 256, %s17_s15, [#allocation3], %s300_s17, %s300_s17, %s301_s18  }
  0x17   :  { %s302_s24 = smov [#allocation7]  }
  0x18   :  { %s40_s25 = sshll.u32 %s302_s24, 4  ;;  %s41_s25 = int_to_ptr.vmem [resolvable:$true] %s40_s25 }
  0x19   :  { %s260_s26 = scalar_lea.vmem %s41_s25, 512  ;;  %p265_p11 = scmp.lt.s32.totalorder %s41_s25, %s41_s25 }
  0x1a   :  { %p261_p10 = scmp.ne.s32.totalorder %s41_s25, %s260_s26  ;;  %p266_p12 = scmp.lt.s32.totalorder %s260_s26, %s260_s26 }
  0x1c   :  { %p267_p13 = por %p266_p12, %p265_p11 }
  0x1e   :  { %p268_p0 = pnand %p267_p13, %p261_p10 }
  0x20   :  { %271 = shalt.err (!%p268_p0)
}
  0x21   :  { %s303_s1 = smov 128   ;;  %s304_s27 = smov 8  }
  0x22   :  { %46 = dma.hbm_to_vmem [thread:$0]  %s346_s2, 512, %s41_s25, [#allocation6], %s303_s1, %s303_s1, %s304_s27  }
  0x23   :  { %292 = dma.done.wait [#allocation3], 256  }
  0x24   :  { %293 = vsyncadd [#allocation3], 4294967040 }
  0x25   :  { %294 = dma.done.wait [#allocation6], 896  }
  0x26   :  { %295 = vsyncadd [#allocation6], 4294966400  ;;  %v207_v0 = vld [vmem:[#allocation5 + $0x10] sm:$0xff]   ;;  %v208_v1 = vld [vmem:[#allocation5 + $0x8] sm:$0xff]   ;;  %vm99_vm0 = vcmask 392192   ;;  %s305_s0 = smov [#allocation8]  }
  0x27   :  { %189 = vmatprep.subr.bf16.mxu0 %v207_v0  ;;  %v210_v2 = vld [vmem:[#allocation2] sm:$0xff]   ;;  %v209_v3 = vld [vmem:[#allocation5] sm:$0xff]   ;;  %v211_v4 = vld [vmem:[#allocation2 + $0x8] sm:$0xff]   ;;  %s164_s2 = sshll.u32 %s305_s0, 4  ;;  %s165_s2 = int_to_ptr.vmem [resolvable:$true] %s164_s2 }
  0x28   :  { %190 = vmatpush3.bf16.msra.mxu0 %v207_v0  ;;  %195 = vmatprep.mubr.msk.bf16.mxu0 %vm99_vm0, %v210_v2  ;;  %v69_v5 = vld [vmem:[#allocation7 + $0x10] sm:$0xff]  ;;  %v67_v7 = vld [vmem:[#allocation7] sm:$0xff]  ;;  %v70_v10 = vld [vmem:[#allocation7 + $0x18] sm:$0xff]  ;;  %s272_s30 = scalar_lea.vmem %s165_s2, 512  ;;  %p277_p2 = scmp.lt.s32.totalorder %s165_s2, %s165_s2 }
  0x29   :  { %191 = vmatprep.subr.bf16.mxu0 %v208_v1  ;;  %v68_v13 = vld [vmem:[#allocation7 + $0x8] sm:$0xff]  ;;  %p273_p1 = scmp.ne.s32.totalorder %s165_s2, %s272_s30  ;;  %p278_p3 = scmp.lt.s32.totalorder %s272_s30, %s272_s30 }
  0x2b   :  { %p279_p4 = por %p278_p3, %p277_p2 }
  0x2c   :  { %192 = vmatpush3.bf16.msra.mxu0 %v208_v1 }
  0x2d   :  { %193 = vmatprep.subr.bf16.mxu0 %v209_v3  ;;  %p280_p5 = pnand %p279_p4, %p273_p1 }
  0x30   :  { %194 = vmatpush3.bf16.msra.mxu0 %v209_v3 }
  0x33   :  { %196 = vmatmul.mubr.msk.bf16.vlgmr.msra.gmra.mxu0 %vm99_vm0, %v211_v4 }
  0xf3   :  { %v197_v6 = vpop.f32.mrf.mxu0 }
  0xf4   :  { %v149_v8 = vadd.f32 %v197_v6, %v69_v5 }
  0xf5   :  { %v140_v9 = vpop.f32.mrf.mxu0 }
  0xf6   :  { %157 = vst [vmem:[#allocation8 + $0x10] sm:$0xff] %v149_v8  ;;  %v141_v11 = vadd.f32 %v140_v9, %v67_v7 }
  0xf7   :  { %v198_v12 = vpop.f32.mrf.mxu0 }
  0xf8   :  { %155 = vst [vmem:[#allocation8] sm:$0xff] %v141_v11  ;;  %v152_v14 = vadd.f32 %v198_v12, %v70_v10 }
  0xf9   :  { %v143_v15 = vpop.f32.mrf.mxu0 }
  0xfa   :  { %158 = vst [vmem:[#allocation8 + $0x18] sm:$0xff] %v152_v14  ;;  %v144_v16 = vadd.f32 %v143_v15, %v68_v13 }
  0xfc   :  { %156 = vst [vmem:[#allocation8 + $0x8] sm:$0xff] %v144_v16 }
  0xfd   :  { %283 = shalt.err (!%p280_p5)
}
  0xfe   :  { %170 = dma.vmem_to_hbm [thread:$0]  %s165_s2, 512, %s347_s3, [#allocation4], %s303_s1, %s303_s1, %s304_s27  }
  0xff   :  { %296 = dma.done.wait [#allocation4], 512  }
 0x100   :  { %297 = vsyncadd [#allocation4], 4294966784 }
 0x101   :  { %174 = vsyncpa [#allocation3], 1 }
 0x102   :  { %175 = vsyncpa [#allocation6], 1 }
 0x103   :  { %176 = vsyncpa [#allocation4], 1 }

</bundles_post_ra>
